<compile_context>
chip_gen: v5e
topology: v5e:2x2
jax: 0.10.0
libtpu: 0.0.40
codegen_flags: <defaults>
</compile_context>

<pallas_src>
from functools import partial

import jax
import jax.numpy as jnp
from jax.experimental import pallas as pl
from jax.experimental.pallas import tpu as pltpu

_EPS = 1e-5
_NEG_SLOPE = 0.01  # F.leaky_relu default


# ---------------------------------------------------------------------------
# Generation-aware VMEM budgeting (computed once at import time).
# ---------------------------------------------------------------------------
def _vmem_capacity_bytes():
    try:
        info = pltpu.get_tpu_info()
        for attr in ("vmem_capacity_bytes", "vmem_size_bytes", "vmem_bytes"):
            v = getattr(info, attr, None)
            if v:
                return int(v)
    except Exception:
        pass
    # Conservative fallback: assume the smallest (v7x-sized) VMEM.
    return 64 << 20


_VMEM_PHYS = _vmem_capacity_bytes()
_IS_SMALL_VMEM = _VMEM_PHYS <= (64 << 20)        # v7x-like: 64 MiB/TC, 2 TCs
_ACT_BUDGET = (14 << 20) if _IS_SMALL_VMEM else (18 << 20)   # activations
_VMEM_LIMIT = (48 << 20) if _IS_SMALL_VMEM else (64 << 20)   # scoped limit
# Conservative estimate of live VMEM per slab row (bf16 input/activations,
# f32 conv outputs, wide-K LHS slabs, relayout copies, double buffers).
_PER_ROW_BYTES = 4 * 1024


# ---------------------------------------------------------------------------
# Pallas kernel: whole forward pass for a block of B samples per grid step.
# Activations: 2D slab (rows, channels); channels on the lane dimension.
# Samples are stacked along the row axis with a fixed per-sample stride; rows
# that straddle sample boundaries / padding are finite garbage never read
# when producing valid rows (all bookkeeping is static, wrapper slices).
# ---------------------------------------------------------------------------
def audionet_kernel(x_ref,
                    w1_ref, b1_ref,
                    w2_ref, b2_ref,
                    w3_ref, b3_ref,
                    w4_ref, b4_ref,
                    o_ref):
    f32, bf16 = jnp.float32, jnp.bfloat16

    def bias_leaky(acc, b_ref, out_dtype):
        # acc is the f32 MXU accumulator; bias + LeakyReLU in f32, cast once.
        acc = acc + b_ref[...]
        return jnp.where(acc > 0, acc, _NEG_SLOPE * acc).astype(out_dtype)

    def conv_wide_k(x, w2d_ref, b_ref, out_dtype):
        # 3 taps stacked along K (lane axis) -> ONE MXU dot.  Used for conv2,
        # whose Cin=128 makes the concat offsets (0/128/256) lane-aligned.
        t = x.shape[0]
        lhs = jnp.concatenate([x[0:t - 2, :], x[1:t - 1, :], x[2:t, :]],
                              axis=1)                          # (t-2, 3*Cin)
        return bias_leaky(
            jnp.dot(lhs, w2d_ref[...], preferred_element_type=f32),
            b_ref, out_dtype)

    def conv_per_tap(x, w_ref, b_ref, out_dtype):
        # Narrow tail layers (<10% of total FLOPs): keep the proven 3-dot
        # form; lane offsets 64/32 are not worth a risky unaligned concat.
        t = x.shape[0]
        acc = jnp.zeros((t - 2, w_ref.shape[2]), f32)
        for k in range(3):                                     # static unroll
            acc = acc + jnp.dot(x[k:k + t - 2, :], w_ref[k],
                                preferred_element_type=f32)
        return bias_leaky(acc, b_ref, out_dtype)

    def maxpool2(x):
        # MaxPool1d(2), floor semantics (drop a trailing odd row); runs on
        # the f32 conv output.
        t, c = x.shape
        t2 = (t // 2) * 2
        return jnp.max(x[0:t2, :].reshape(t2 // 2, 2, c), axis=1)

    x = x_ref[...]                                       # (T, 90) bf16 im2col
    # conv1: im2col built in the wrapper -> single wide-K dot here.
    h = bias_leaky(jnp.dot(x, w1_ref[...], preferred_element_type=f32),
                   b1_ref, bf16)                         # (T,     128) bf16
    h = conv_wide_k(h, w2_ref, b2_ref, f32)              # (T-2,    64) bn1 folded
    h = maxpool2(h).astype(bf16)                         # (T/2-1,  64) bf16
    h = conv_per_tap(h, w3_ref, b3_ref, bf16)            # (T/2-3,  32) bn2 folded
    h = conv_per_tap(h, w4_ref, b4_ref, f32)             # (T/2-5,  16) f32
    h = maxpool2(h)                                      # (T/4-3,  16) f32

    # Epilogue: zero the (tiny) output block, then a direct partial store of
    # the valid rows — no full-slab concatenate copy.  The 3 zero tail rows
    # are garbage territory that the wrapper slices off anyway.
    o_ref[...] = jnp.zeros(o_ref.shape, o_ref.dtype)
    o_ref[pl.ds(0, h.shape[0]), :] = h


# ---------------------------------------------------------------------------
# Wrapper
# ---------------------------------------------------------------------------
def _full_spec(arr):
    rank = arr.ndim
    return pl.BlockSpec(arr.shape, lambda i, _r=rank: (0,) * _r)


def _fold_bn_into_conv(w, b, gamma, beta, mean, var):
    """Fold conv(BN(x)) into new (w, b); BN(x) = x*scale + shift (eval mode)."""
    scale = gamma / jnp.sqrt(var + _EPS)                 # (1, Cin)
    shift = beta - mean * scale                          # (1, Cin)
    w_f = w * scale.reshape(1, -1, 1)                    # (3, Cin, Cout)
    b_f = b + shift @ jnp.sum(w, axis=0)                 # (1, Cout)
    return w_f, b_f


@partial(jax.jit, static_argnames=("max_bb",))
def audionet_forward(x_ncl, params, max_bb=None):
    """x_ncl: (N, 30, L) float32 (PyTorch NCL) -> (N, 16, P2) float32."""
    n, c_in, l0 = x_ncl.shape
    assert c_in == 30
    p1 = (l0 - 4) // 2          # length after conv1, conv2, mp1 (floor)
    p2 = (p1 - 4) // 2          # length after conv3, conv4, mp2 (floor)
    assert p2 >= 1, "input length too short for AudioNet"

    # Pad each sample's length to a multiple of 32 so the per-sample row
    # stride stays divisible through both maxpools and block row counts
    # satisfy the (8/16, 128) BlockSpec divisibility rule.
    l0p = -(-l0 // 32) * 32
    s2 = l0p // 4               # per-sample row stride of the kernel output

    assert l0p * _PER_ROW_BYTES <= _ACT_BUDGET, (
        "sequence too long for a single-length block; "
        "TODO(synk): add a length grid axis with a 2-row halo")

    # Batch-block size from the generation-aware VMEM budget (no hard cap).
    bb = max(1, min(n, _ACT_BUDGET // (l0p * _PER_ROW_BYTES)))
    if max_bb is not None:
        bb = max(1, min(bb, max_bb))
    if _IS_SMALL_VMEM and n > 1:
        # v7x has 2 TensorCores: keep >= 2 grid steps so the "parallel"
        # batch axis can give both cores work.
        bb = min(bb, -(-n // 2))
    n_pad = -(-n // bb) * bb

    # NCL -> NLC, pad, and build the conv1 im2col (3 taps stacked on the lane
    # axis, per-sample shifts with zero tails) in the wrapper, so conv1 is a
    # single wide-K dot in the kernel.  Stored as bf16 to halve input DMA.
    x_nlc = jnp.transpose(x_ncl, (0, 2, 1)).astype(jnp.float32)
    x_nlc = jnp.pad(x_nlc, ((0, n_pad - n), (0, l0p - l0), (0, 0)))
    taps = [x_nlc,
            jnp.pad(x_nlc[:, 1:, :], ((0, 0), (0, 1), (0, 0))),
            jnp.pad(x_nlc[:, 2:, :], ((0, 0), (0, 2), (0, 0)))]
    x2d = jnp.concatenate(taps, axis=-1).reshape(n_pad * l0p, 90)
    x2d = x2d.astype(jnp.bfloat16)

    # Fold BN (running stats) into the following convs; lay conv1/conv2 taps
    # out along K ((3, Cin, Cout) -> (3*Cin, Cout)) for the wide-K dots;
    # conv3/conv4 stay 3D (per-tap dots in the kernel).  bf16 MXU weights.
    w2f, b2f = _fold_bn_into_conv(params["w2"], params["b2"], params["g1"],
                                  params["bt1"], params["rm1"], params["rv1"])
    w3f, b3f = _fold_bn_into_conv(params["w3"], params["b3"], params["g2"],
                                  params["bt2"], params["rm2"], params["rv2"])
    bf16 = jnp.bfloat16
    plist = [
        params["w1"].reshape(90, 128).astype(bf16), params["b1"],
        w2f.reshape(384, 64).astype(bf16), b2f,
        w3f.astype(bf16), b3f,
        params["w4"].astype(bf16), params["b4"],
    ]

    out2d = pl.pallas_call(
        audionet_kernel,
        out_shape=jax.ShapeDtypeStruct((n_pad * s2, 16), jnp.float32),
        grid=(n_pad // bb,),
        in_specs=[pl.BlockSpec((bb * l0p, 90), lambda i: (i, 0))]
                 + [_full_spec(p) for p in plist],
        out_specs=pl.BlockSpec((bb * s2, 16), lambda i: (i, 0)),
        compiler_params=pltpu.CompilerParams(
            dimension_semantics=("parallel",),        # samples independent
            vmem_limit_bytes=_VMEM_LIMIT),
    )(x2d, *plist)

    out = out2d.reshape(n_pad, s2, 16)[:n, :p2, :]    # drop garbage rows
    return jnp.transpose(out, (0, 2, 1))              # back to NCL (N,16,P2)


# ---------------------------------------------------------------------------
# Pure-JAX reference (mirrors the PyTorch forward, eval mode, f32)
# ---------------------------------------------------------------------------
def reference_forward(x_ncl, p):
    x = jnp.transpose(x_ncl, (0, 2, 1))  # (N, L, C)

    def conv(x, w, b):  # w: (3, Cin, Cout), b: (1, Cout)
        l_out = x.shape[1] - 2
        acc = sum(jnp.einsum("nlc,cd->nld", x[:, k:k + l_out, :], w[k])
                  for k in range(3))
        return acc + b[None]

    def leaky(x):
        return jnp.where(x > 0, x, _NEG_SLOPE * x)

    def bn(x, g, bt, rm, rv):
        return (x - rm[None]) / jnp.sqrt(rv[None] + _EPS) * g[None] + bt[None]

    def mp2(x):  # MaxPool1d(2), floor: drop trailing element for odd lengths
        n, l, c = x.shape
        l2 = (l // 2) * 2
        return jnp.max(x[:, :l2].reshape(n, l // 2, 2, c), axis=2)

    h = leaky(conv(x, p["w1"], p["b1"]))
    h = bn(h, p["g1"], p["bt1"], p["rm1"], p["rv1"])
    h = leaky(conv(h, p["w2"], p["b2"]))
    h = mp2(h)
    h = bn(h, p["g2"], p["bt2"], p["rm2"], p["rv2"])
    h = leaky(conv(h, p["w3"], p["b3"]))
    h = leaky(conv(h, p["w4"], p["b4"]))
    h = mp2(h)
    return jnp.transpose(h, (0, 2, 1))


# ---------------------------------------------------------------------------
# Deterministic parameter init (shapes from AudioNet.__init__)
# ---------------------------------------------------------------------------
def init_params(key):
    ks = jax.random.split(key, 20)
    f32 = jnp.float32

    def w(k, shape, scale=0.05):
        return (scale * jax.random.normal(k, shape)).astype(f32)

    params = {
        # Conv1d weights pre-transposed from PyTorch (Cout, Cin, K) -> (K, Cin, Cout)
        "w1": w(ks[0], (3, 30, 128)),  "b1": w(ks[1], (1, 128)),
        "g1": (1.0 + 0.1 * jax.random.normal(ks[2], (1, 128))).astype(f32),
        "bt1": w(ks[3], (1, 128)),
        "rm1": w(ks[4], (1, 128)),
        "rv1": jax.random.uniform(ks[5], (1, 128), f32, 0.5, 1.5),

        "w2": w(ks[6], (3, 128, 64)), "b2": w(ks[7], (1, 64)),
        "g2": (1.0 + 0.1 * jax.random.normal(ks[8], (1, 64))).astype(f32),
        "bt2": w(ks[9], (1, 64)),
        "rm2": w(ks[10], (1, 64)),
        "rv2": jax.random.uniform(ks[11], (1, 64), f32, 0.5, 1.5),

        "w3": w(ks[12], (3, 64, 32)), "b3": w(ks[13], (1, 32)),
        "w4": w(ks[14], (3, 32, 16)), "b4": w(ks[15], (1, 16)),
        # self.out / self.out1 Linear layers are unused by forward() -> omitted
    }
    return params


if __name__ == "__main__":
    root = jax.random.PRNGKey(0)
    k_params, k_x, k_x2 = jax.random.split(root, 3)

    params = init_params(k_params)

    # Tolerance note: matmuls run in bf16 (f32 accumulate) on the MXU, so we
    # compare against the f32 reference with a bf16-appropriate tolerance.
    TOL = 3e-2

    # Test A: small input, default (large) batch block.
    # Length chain: 24 -> 22 -> 20 -> mp 10 -> 8 -> 6 -> mp 3.
    x = jax.random.normal(k_x, (2, 30, 24), jnp.float32)
    y_pallas = jax.block_until_ready(audionet_forward(x, params))
    y_ref = jax.block_until_ready(reference_forward(x, params))
    assert y_pallas.shape == (2, 16, 3), y_pallas.shape
    assert jnp.allclose(y_pallas, y_ref, rtol=TOL, atol=TOL), (
        float(jnp.max(jnp.abs(y_pallas - y_ref))))

    # Test B: odd length + forced small block to exercise batch padding and a
    # multi-step grid (max_bb=8 -> n_pad=24, grid=3).
    # Length chain: 25 -> 23 -> 21 -> mp 10 -> 8 -> 6 -> mp 3.
    x2 = jax.random.normal(k_x2, (20, 30, 25), jnp.float32)
    y2_ref = jax.block_until_ready(reference_forward(x2, params))
    y2_pallas = jax.block_until_ready(audionet_forward(x2, params, max_bb=8))
    assert y2_pallas.shape == (20, 16, 3), y2_pallas.shape
    assert jnp.allclose(y2_pallas, y2_ref, rtol=TOL, atol=TOL), (
        float(jnp.max(jnp.abs(y2_pallas - y2_ref))))

    # Test C: same input through the default (budget-driven) batch block.
    y3_pallas = jax.block_until_ready(audionet_forward(x2, params))
    assert y3_pallas.shape == (20, 16, 3), y3_pallas.shape
    assert jnp.allclose(y3_pallas, y2_ref, rtol=TOL, atol=TOL), (
        float(jnp.max(jnp.abs(y3_pallas - y2_ref))))

    print("KERNEL_OK")
</pallas_src>

<mosaic_0001>
module attributes {stable_mosaic.version = 11 : i64} {
  func.func @audionet_kernel(%arg0: i32, %arg1: memref<32x90xbf16, #tpu.memory_space<vmem>>, %arg2: memref<90x128xbf16, #tpu.memory_space<vmem>>, %arg3: memref<1x128xf32, #tpu.memory_space<vmem>>, %arg4: memref<384x64xbf16, #tpu.memory_space<vmem>>, %arg5: memref<1x64xf32, #tpu.memory_space<vmem>>, %arg6: memref<3x64x32xbf16, #tpu.memory_space<vmem>>, %arg7: memref<1x32xf32, #tpu.memory_space<vmem>>, %arg8: memref<3x32x16xbf16, #tpu.memory_space<vmem>>, %arg9: memref<1x16xf32, #tpu.memory_space<vmem>>, %arg10: memref<8x16xf32, #tpu.memory_space<vmem>>) attributes {dimension_semantics = [#tpu.dimension_semantics<parallel>], iteration_bounds = array<i64: 2>, scalar_prefetch = 0 : i64, scratch_operands = 0 : i64, tpu.core_type = #tpu.core_type<tc>, window_params = [{transform_indices = @transform_0, window_bounds = array<i64: 32, 90>}, {pipeline_mode = #tpu.pipeline_mode<synchronous>, transform_indices = @transform_1, window_bounds = array<i64: 90, 128>}, {pipeline_mode = #tpu.pipeline_mode<synchronous>, transform_indices = @transform_2, window_bounds = array<i64: 1, 128>}, {pipeline_mode = #tpu.pipeline_mode<synchronous>, transform_indices = @transform_3, window_bounds = array<i64: 384, 64>}, {pipeline_mode = #tpu.pipeline_mode<synchronous>, transform_indices = @transform_4, window_bounds = array<i64: 1, 64>}, {pipeline_mode = #tpu.pipeline_mode<synchronous>, transform_indices = @transform_5, window_bounds = array<i64: 3, 64, 32>}, {pipeline_mode = #tpu.pipeline_mode<synchronous>, transform_indices = @transform_6, window_bounds = array<i64: 1, 32>}, {pipeline_mode = #tpu.pipeline_mode<synchronous>, transform_indices = @transform_7, window_bounds = array<i64: 3, 32, 16>}, {pipeline_mode = #tpu.pipeline_mode<synchronous>, transform_indices = @transform_8, window_bounds = array<i64: 1, 16>}, {transform_indices = @transform_9, window_bounds = array<i64: 8, 16>}]} {
    %c0 = arith.constant 0 : index
    %c0_0 = arith.constant 0 : index
    %0 = vector.load %arg1[%c0, %c0_0] : memref<32x90xbf16, #tpu.memory_space<vmem>>, vector<32x90xbf16>
    %c0_1 = arith.constant 0 : index
    %c0_2 = arith.constant 0 : index
    %1 = vector.load %arg2[%c0_1, %c0_2] : memref<90x128xbf16, #tpu.memory_space<vmem>>, vector<90x128xbf16>
    %cst = arith.constant dense<0.000000e+00> : vector<32x128xf32>
    %2 = tpu.matmul %0, %1, %cst {dimension_numbers = #tpu.dot_dimension_numbers<[1], [0], [0], [1], [0, 0, 1, 1], [], []>} : vector<32x90xbf16>, vector<90x128xbf16>, vector<32x128xf32> -> vector<32x128xf32>
    %c0_3 = arith.constant 0 : index
    %c0_4 = arith.constant 0 : index
    %3 = vector.load %arg3[%c0_3, %c0_4] : memref<1x128xf32, #tpu.memory_space<vmem>>, vector<1x128xf32>
    %4 = vector.broadcast %3 : vector<1x128xf32> to vector<32x128xf32>
    %5 = arith.addf %2, %4 : vector<32x128xf32>
    %cst_5 = arith.constant 0.000000e+00 : f32
    %6 = vector.broadcast %cst_5 : f32 to vector<32x128xf32>
    %7 = arith.cmpf ogt, %5, %6 : vector<32x128xf32>
    %cst_6 = arith.constant 0.00999999977 : f32
    %8 = vector.broadcast %cst_6 : f32 to vector<32x128xf32>
    %9 = arith.mulf %8, %5 : vector<32x128xf32>
    %10 = arith.select %7, %5, %9 : vector<32x128xi1>, vector<32x128xf32>
    %11 = arith.truncf %10 : vector<32x128xf32> to vector<32x128xbf16>
    %12 = vector.extract_strided_slice %11 {offsets = [0, 0], sizes = [30, 128], strides = [1, 1]} : vector<32x128xbf16> to vector<30x128xbf16>
    %13 = vector.extract_strided_slice %11 {offsets = [1, 0], sizes = [30, 128], strides = [1, 1]} : vector<32x128xbf16> to vector<30x128xbf16>
    %14 = vector.extract_strided_slice %11 {offsets = [2, 0], sizes = [30, 128], strides = [1, 1]} : vector<32x128xbf16> to vector<30x128xbf16>
    %15 = tpu.concatenate %12, %13, %14 in 1 : vector<30x128xbf16>, vector<30x128xbf16>, vector<30x128xbf16> -> vector<30x384xbf16>
    %c0_7 = arith.constant 0 : index
    %c0_8 = arith.constant 0 : index
    %16 = vector.load %arg4[%c0_7, %c0_8] : memref<384x64xbf16, #tpu.memory_space<vmem>>, vector<384x64xbf16>
    %cst_9 = arith.constant dense<0.000000e+00> : vector<30x64xf32>
    %17 = tpu.matmul %15, %16, %cst_9 {dimension_numbers = #tpu.dot_dimension_numbers<[1], [0], [0], [1], [0, 0, 1, 1], [], []>} : vector<30x384xbf16>, vector<384x64xbf16>, vector<30x64xf32> -> vector<30x64xf32>
    %c0_10 = arith.constant 0 : index
    %c0_11 = arith.constant 0 : index
    %18 = vector.load %arg5[%c0_10, %c0_11] : memref<1x64xf32, #tpu.memory_space<vmem>>, vector<1x64xf32>
    %19 = vector.broadcast %18 : vector<1x64xf32> to vector<30x64xf32>
    %20 = arith.addf %17, %19 : vector<30x64xf32>
    %cst_12 = arith.constant 0.000000e+00 : f32
    %21 = vector.broadcast %cst_12 : f32 to vector<30x64xf32>
    %22 = arith.cmpf ogt, %20, %21 : vector<30x64xf32>
    %cst_13 = arith.constant 0.00999999977 : f32
    %23 = vector.broadcast %cst_13 : f32 to vector<30x64xf32>
    %24 = arith.mulf %23, %20 : vector<30x64xf32>
    %25 = arith.select %22, %20, %24 : vector<30x64xi1>, vector<30x64xf32>
    %26 = vector.shape_cast %25 : vector<30x64xf32> to vector<15x2x64xf32>
    %cst_14 = arith.constant dense<0xFF800000> : vector<15x64xf32>
    %27 = vector.multi_reduction <maximumf>, %26, %cst_14 [1] : vector<15x2x64xf32> to vector<15x64xf32>
    %28 = arith.truncf %27 : vector<15x64xf32> to vector<15x64xbf16>
    %cst_15 = arith.constant 0.000000e+00 : f32
    %29 = vector.broadcast %cst_15 : f32 to vector<13x32xf32>
    %30 = vector.extract_strided_slice %28 {offsets = [0, 0], sizes = [13, 64], strides = [1, 1]} : vector<15x64xbf16> to vector<13x64xbf16>
    %c0_16 = arith.constant 0 : index
    %c0_17 = arith.constant 0 : index
    %c0_18 = arith.constant 0 : index
    %31 = vector.load %arg6[%c0_16, %c0_17, %c0_18] : memref<3x64x32xbf16, #tpu.memory_space<vmem>>, vector<1x64x32xbf16>
    %32 = vector.shape_cast %31 : vector<1x64x32xbf16> to vector<64x32xbf16>
    %cst_19 = arith.constant dense<0.000000e+00> : vector<13x32xf32>
    %33 = tpu.matmul %30, %32, %cst_19 {dimension_numbers = #tpu.dot_dimension_numbers<[1], [0], [0], [1], [0, 0, 1, 1], [], []>} : vector<13x64xbf16>, vector<64x32xbf16>, vector<13x32xf32> -> vector<13x32xf32>
    %34 = arith.addf %29, %33 : vector<13x32xf32>
    %35 = vector.extract_strided_slice %28 {offsets = [1, 0], sizes = [13, 64], strides = [1, 1]} : vector<15x64xbf16> to vector<13x64xbf16>
    %c1 = arith.constant 1 : index
    %c0_20 = arith.constant 0 : index
    %c0_21 = arith.constant 0 : index
    %36 = vector.load %arg6[%c1, %c0_20, %c0_21] : memref<3x64x32xbf16, #tpu.memory_space<vmem>>, vector<1x64x32xbf16>
    %37 = vector.shape_cast %36 : vector<1x64x32xbf16> to vector<64x32xbf16>
    %cst_22 = arith.constant dense<0.000000e+00> : vector<13x32xf32>
    %38 = tpu.matmul %35, %37, %cst_22 {dimension_numbers = #tpu.dot_dimension_numbers<[1], [0], [0], [1], [0, 0, 1, 1], [], []>} : vector<13x64xbf16>, vector<64x32xbf16>, vector<13x32xf32> -> vector<13x32xf32>
    %39 = arith.addf %34, %38 : vector<13x32xf32>
    %40 = vector.extract_strided_slice %28 {offsets = [2, 0], sizes = [13, 64], strides = [1, 1]} : vector<15x64xbf16> to vector<13x64xbf16>
    %c2 = arith.constant 2 : index
    %c0_23 = arith.constant 0 : index
    %c0_24 = arith.constant 0 : index
    %41 = vector.load %arg6[%c2, %c0_23, %c0_24] : memref<3x64x32xbf16, #tpu.memory_space<vmem>>, vector<1x64x32xbf16>
    %42 = vector.shape_cast %41 : vector<1x64x32xbf16> to vector<64x32xbf16>
    %cst_25 = arith.constant dense<0.000000e+00> : vector<13x32xf32>
    %43 = tpu.matmul %40, %42, %cst_25 {dimension_numbers = #tpu.dot_dimension_numbers<[1], [0], [0], [1], [0, 0, 1, 1], [], []>} : vector<13x64xbf16>, vector<64x32xbf16>, vector<13x32xf32> -> vector<13x32xf32>
    %44 = arith.addf %39, %43 : vector<13x32xf32>
    %c0_26 = arith.constant 0 : index
    %c0_27 = arith.constant 0 : index
    %45 = vector.load %arg7[%c0_26, %c0_27] : memref<1x32xf32, #tpu.memory_space<vmem>>, vector<1x32xf32>
    %46 = vector.broadcast %45 : vector<1x32xf32> to vector<13x32xf32>
    %47 = arith.addf %44, %46 : vector<13x32xf32>
    %cst_28 = arith.constant 0.000000e+00 : f32
    %48 = vector.broadcast %cst_28 : f32 to vector<13x32xf32>
    %49 = arith.cmpf ogt, %47, %48 : vector<13x32xf32>
    %cst_29 = arith.constant 0.00999999977 : f32
    %50 = vector.broadcast %cst_29 : f32 to vector<13x32xf32>
    %51 = arith.mulf %50, %47 : vector<13x32xf32>
    %52 = arith.select %49, %47, %51 : vector<13x32xi1>, vector<13x32xf32>
    %53 = arith.truncf %52 : vector<13x32xf32> to vector<13x32xbf16>
    %cst_30 = arith.constant 0.000000e+00 : f32
    %54 = vector.broadcast %cst_30 : f32 to vector<11x16xf32>
    %55 = vector.extract_strided_slice %53 {offsets = [0, 0], sizes = [11, 32], strides = [1, 1]} : vector<13x32xbf16> to vector<11x32xbf16>
    %c0_31 = arith.constant 0 : index
    %c0_32 = arith.constant 0 : index
    %c0_33 = arith.constant 0 : index
    %56 = vector.load %arg8[%c0_31, %c0_32, %c0_33] : memref<3x32x16xbf16, #tpu.memory_space<vmem>>, vector<1x32x16xbf16>
    %57 = vector.shape_cast %56 : vector<1x32x16xbf16> to vector<32x16xbf16>
    %cst_34 = arith.constant dense<0.000000e+00> : vector<11x16xf32>
    %58 = tpu.matmul %55, %57, %cst_34 {dimension_numbers = #tpu.dot_dimension_numbers<[1], [0], [0], [1], [0, 0, 1, 1], [], []>} : vector<11x32xbf16>, vector<32x16xbf16>, vector<11x16xf32> -> vector<11x16xf32>
    %59 = arith.addf %54, %58 : vector<11x16xf32>
    %60 = vector.extract_strided_slice %53 {offsets = [1, 0], sizes = [11, 32], strides = [1, 1]} : vector<13x32xbf16> to vector<11x32xbf16>
    %c1_35 = arith.constant 1 : index
    %c0_36 = arith.constant 0 : index
    %c0_37 = arith.constant 0 : index
    %61 = vector.load %arg8[%c1_35, %c0_36, %c0_37] : memref<3x32x16xbf16, #tpu.memory_space<vmem>>, vector<1x32x16xbf16>
    %62 = vector.shape_cast %61 : vector<1x32x16xbf16> to vector<32x16xbf16>
    %cst_38 = arith.constant dense<0.000000e+00> : vector<11x16xf32>
    %63 = tpu.matmul %60, %62, %cst_38 {dimension_numbers = #tpu.dot_dimension_numbers<[1], [0], [0], [1], [0, 0, 1, 1], [], []>} : vector<11x32xbf16>, vector<32x16xbf16>, vector<11x16xf32> -> vector<11x16xf32>
    %64 = arith.addf %59, %63 : vector<11x16xf32>
    %65 = vector.extract_strided_slice %53 {offsets = [2, 0], sizes = [11, 32], strides = [1, 1]} : vector<13x32xbf16> to vector<11x32xbf16>
    %c2_39 = arith.constant 2 : index
    %c0_40 = arith.constant 0 : index
    %c0_41 = arith.constant 0 : index
    %66 = vector.load %arg8[%c2_39, %c0_40, %c0_41] : memref<3x32x16xbf16, #tpu.memory_space<vmem>>, vector<1x32x16xbf16>
    %67 = vector.shape_cast %66 : vector<1x32x16xbf16> to vector<32x16xbf16>
    %cst_42 = arith.constant dense<0.000000e+00> : vector<11x16xf32>
    %68 = tpu.matmul %65, %67, %cst_42 {dimension_numbers = #tpu.dot_dimension_numbers<[1], [0], [0], [1], [0, 0, 1, 1], [], []>} : vector<11x32xbf16>, vector<32x16xbf16>, vector<11x16xf32> -> vector<11x16xf32>
    %69 = arith.addf %64, %68 : vector<11x16xf32>
    %c0_43 = arith.constant 0 : index
    %c0_44 = arith.constant 0 : index
    %70 = vector.load %arg9[%c0_43, %c0_44] : memref<1x16xf32, #tpu.memory_space<vmem>>, vector<1x16xf32>
    %71 = vector.broadcast %70 : vector<1x16xf32> to vector<11x16xf32>
    %72 = arith.addf %69, %71 : vector<11x16xf32>
    %cst_45 = arith.constant 0.000000e+00 : f32
    %73 = vector.broadcast %cst_45 : f32 to vector<11x16xf32>
    %74 = arith.cmpf ogt, %72, %73 : vector<11x16xf32>
    %cst_46 = arith.constant 0.00999999977 : f32
    %75 = vector.broadcast %cst_46 : f32 to vector<11x16xf32>
    %76 = arith.mulf %75, %72 : vector<11x16xf32>
    %77 = arith.select %74, %72, %76 : vector<11x16xi1>, vector<11x16xf32>
    %78 = vector.extract_strided_slice %77 {offsets = [0, 0], sizes = [10, 16], strides = [1, 1]} : vector<11x16xf32> to vector<10x16xf32>
    %79 = vector.shape_cast %78 : vector<10x16xf32> to vector<5x2x16xf32>
    %cst_47 = arith.constant dense<0xFF800000> : vector<5x16xf32>
    %80 = vector.multi_reduction <maximumf>, %79, %cst_47 [1] : vector<5x2x16xf32> to vector<5x16xf32>
    %cst_48 = arith.constant 0.000000e+00 : f32
    %81 = vector.broadcast %cst_48 : f32 to vector<8x16xf32>
    %c0_49 = arith.constant 0 : index
    %c0_50 = arith.constant 0 : index
    %82 = vector.load %arg10[%c0_49, %c0_50] : memref<8x16xf32, #tpu.memory_space<vmem>>, vector<8x16xf32>
    tpu.vector_store %arg10[%c0_49, %c0_50], %81 {strides = array<i32>} : memref<8x16xf32, #tpu.memory_space<vmem>>, vector<8x16xf32>,
    %c0_51 = arith.constant 0 : index
    %c0_52 = arith.constant 0 : index
    %83 = vector.load %arg10[%c0_51, %c0_52] : memref<8x16xf32, #tpu.memory_space<vmem>>, vector<5x16xf32>
    tpu.vector_store %arg10[%c0_51, %c0_52], %80 {strides = array<i32>} : memref<8x16xf32, #tpu.memory_space<vmem>>, vector<5x16xf32>,
    return
  }
  func.func @transform_0(%arg0: i32) -> (i32, i32) {
    %c0_i32 = arith.constant 0 : i32
    %c0_i32_0 = arith.constant 0 : i32
    return %arg0, %c0_i32 : i32, i32
  }
  func.func @transform_1(%arg0: i32) -> (i32, i32) {
    %c0_i32 = arith.constant 0 : i32
    %c0_i32_0 = arith.constant 0 : i32
    %c0_i32_1 = arith.constant 0 : i32
    return %c0_i32, %c0_i32_0 : i32, i32
  }
  func.func @transform_2(%arg0: i32) -> (i32, i32) {
    %c0_i32 = arith.constant 0 : i32
    %c0_i32_0 = arith.constant 0 : i32
    %c0_i32_1 = arith.constant 0 : i32
    return %c0_i32, %c0_i32_0 : i32, i32
  }
  func.func @transform_3(%arg0: i32) -> (i32, i32) {
    %c0_i32 = arith.constant 0 : i32
    %c0_i32_0 = arith.constant 0 : i32
    %c0_i32_1 = arith.constant 0 : i32
    return %c0_i32, %c0_i32_0 : i32, i32
  }
  func.func @transform_4(%arg0: i32) -> (i32, i32) {
    %c0_i32 = arith.constant 0 : i32
    %c0_i32_0 = arith.constant 0 : i32
    %c0_i32_1 = arith.constant 0 : i32
    return %c0_i32, %c0_i32_0 : i32, i32
  }
  func.func @transform_5(%arg0: i32) -> (i32, i32, i32) {
    %c0_i32 = arith.constant 0 : i32
    %c0_i32_0 = arith.constant 0 : i32
    %c0_i32_1 = arith.constant 0 : i32
    %c0_i32_2 = arith.constant 0 : i32
    return %c0_i32, %c0_i32_0, %c0_i32_1 : i32, i32, i32
  }
  func.func @transform_6(%arg0: i32) -> (i32, i32) {
    %c0_i32 = arith.constant 0 : i32
    %c0_i32_0 = arith.constant 0 : i32
    %c0_i32_1 = arith.constant 0 : i32
    return %c0_i32, %c0_i32_0 : i32, i32
  }
  func.func @transform_7(%arg0: i32) -> (i32, i32, i32) {
    %c0_i32 = arith.constant 0 : i32
    %c0_i32_0 = arith.constant 0 : i32
    %c0_i32_1 = arith.constant 0 : i32
    %c0_i32_2 = arith.constant 0 : i32
    return %c0_i32, %c0_i32_0, %c0_i32_1 : i32, i32, i32
  }
  func.func @transform_8(%arg0: i32) -> (i32, i32) {
    %c0_i32 = arith.constant 0 : i32
    %c0_i32_0 = arith.constant 0 : i32
    %c0_i32_1 = arith.constant 0 : i32
    return %c0_i32, %c0_i32_0 : i32, i32
  }
  func.func @transform_9(%arg0: i32) -> (i32, i32) {
    %c0_i32 = arith.constant 0 : i32
    %c0_i32_0 = arith.constant 0 : i32
    return %arg0, %c0_i32 : i32, i32
  }
}

</mosaic_0001>

<bundles_post_ra>
// kernel: audionet_forward.1
= control target key start
LH: loop header
LB: loop body
LE: loop exit
PB: predicated region body
PF: predicated region fallthrough
CT: control target
= control target key end

     0   :  { %s1749_s30 = smov 0   ;;  %s2031_s0 = inlined_call_operand.vmem [shape: bf16[64,90], index: 0, kind: input, shape index: {}]   ;;  %s2032_s1 = inlined_call_operand.vmem [shape: bf16[90,128], index: 1, kind: input, shape index: {}]   ;;  %s2033_s2 = inlined_call_operand.vmem [shape: f32[1,128], index: 2, kind: input, shape index: {}]   ;;  %s2034_s3 = inlined_call_operand.vmem [shape: bf16[384,64], index: 3, kind: input, shape index: {}]   ;;  %s2035_s4 = inlined_call_operand.vmem [shape: f32[1,64], index: 4, kind: input, shape index: {}]   ;;  %s2036_s5 = inlined_call_operand.vmem [shape: bf16[3,64,32], index: 5, kind: input, shape index: {}]   ;;  %s2037_s6 = inlined_call_operand.vmem [shape: f32[1,32], index: 6, kind: input, shape index: {}]   ;;  %s2038_s7 = inlined_call_operand.vmem [shape: bf16[3,32,16], index: 7, kind: input, shape index: {}]   ;;  %s2039_s8 = inlined_call_operand.vmem [shape: f32[1,16], index: 8, kind: input, shape index: {}]   ;;  %s2040_s9 = inlined_call_operand.vmem [shape: f32[16,16], index: 9, kind: output, shape index: {}]  }
   0x1 LB: > { %s1755_s10 = sadd.s32 4294967295, %s1696_s30   ;;  %p1389_p0 = scmp.ge.s32.totalorder %s1696_s30, 1  ;;  %s1696_s30 = sphi %s1749_s30, %s19_s30  }
   0x2   : > { %p288_p1 = scmp.lt.s32.totalorder %s1696_s30, 3 }
   0x4   : > { %p289_p2 = pnand %p1389_p0, %p288_p1 }
   0x5   : > { %s1390_s17 = sshll.u32 (!%p289_p2), %s1755_s10, 2  ;;  %p329_p4 = scmp.lt.s32.totalorder (!%p289_p2), %s1755_s10, 1 }
   0x6   : > { %292 = sbr.rel (%p289_p2) target bundleno = 728 (0x2d8), region = 56  ;;  %p324_p3 = scmp.lt.s32.totalorder (!%p289_p2), %s1390_s17, 7 }
   0xb   : > { %v1423_v0 = vld [vmem:[%s2032_s1 + $0x28] sm:$0xf]  ;;  %v1634_v1 = vld [vmem:[%s2032_s1 + $0x28] sm:$0x10]  ;;  %vm406_vm0 = vcmask 1044480   ;;  %v1633_v4 = vld [vmem:[%s2032_s1 + $0x20] sm:$0xff] }
   0xc   : > { %v1424_v2 = vor.u32 %v1634_v1, %v1423_v0  ;;  %v1632_v5 = vld [vmem:[%s2032_s1 + $0x18] sm:$0xff]  ;;  %v1631_v7 = vld [vmem:[%s2032_s1 + $0x10] sm:$0xff]  ;;  %s2042_s17 = smov (!%p324_p3, %s1390_s17), 7  ;;  %v1630_v9 = vld [vmem:[%s2032_s1 + $0x8] sm:$0xff]  ;;  %vm399_vm1 = vcmask 736256   ;;  %vm475_vm6 = vcmask 1046528  }
   0xd   : > { %v1642_v6 = vld [vmem:[%s2034_s3 + $0x38] sm:$0xff]  ;;  %v1641_v8 = vld [vmem:[%s2034_s3 + $0x30] sm:$0xff]  ;;  %s1391_s28 = sshll.u32 %s2042_s17, 2  ;;  %v1640_v10 = vld [vmem:[%s2034_s3 + $0x28] sm:$0xff]  ;;  %vm457_vm7 = vsmask.f32 7424 }
   0xe   : > { %v408_v3 = vsel %vm406_vm0, %v1424_v2, 0  ;;  %677 = vmatpush.bf16.msra.mxu1 %v1642_v6  ;;  %v1629_v11 = vld [vmem:[%s2032_s1] sm:$0xff]  ;;  %s327_s16 = scalar_lea.vmem %s2031_s0, %s1391_s28  ;;  %v1638_v15 = vld [vmem:[%s2034_s3 + $0x18] sm:$0xff]  ;;  %v1637_v17 = vld [vmem:[%s2034_s3 + $0x10] sm:$0xff]  ;;  %vm772_vm9 = vcmask 517120   ;;  %vm949_vm13 = vcmask 1041409  }
   0xf   : > { %412 = vmatpush.bf16.msra.mxu0 %v408_v3  ;;  %v1627_v12 = vld [vmem:[%s327_s16] sm:$0xff]  ;;  %v1628_v13 = vld [vmem:[%s327_s16 + $0x8] sm:$0xff]  ;;  %v1658_v16 = vld [vmem:[%s2034_s3 + $0xb8] sm:$0xff]  ;;  %vm951_vm14 = vcmask 1042434   ;;  %vm953_vm15 = vcmask 1043459   ;;  %vm955_vm0 = vcmask 1044484  }
  0x10   : > { %v1639_v14 = vld [vmem:[%s2034_s3 + $0x20] sm:$0xff]  ;;  %715 = vmatpush.bf16.msra.mxu3 %v1658_v16  ;;  %v1650_v18 = vld [vmem:[%s2034_s3 + $0x78] sm:$0xff]  ;;  %v1657_v19 = vld [vmem:[%s2034_s3 + $0xb0] sm:$0xff]  ;;  %s2044_s10 = smov (!%p329_p4, %s1755_s10), 1 }
  0x11   : > { %696 = vmatpush.bf16.msra.mxu2 %v1650_v18  ;;  %v1636_v20 = vld [vmem:[%s2034_s3 + $0x8] sm:$0xff]  ;;  %v1649_v21 = vld [vmem:[%s2034_s3 + $0x70] sm:$0xff]  ;;  %v1635_v23 = vld [vmem:[%s2034_s3] sm:$0xff]  ;;  %s1392_s25 = sshll.u32 %s2044_s10, 3 }
  0x12   : > { %678 = vmatpush.bf16.msra.mxu1 %v1641_v8  ;;  %v1656_v22 = vld [vmem:[%s2034_s3 + $0xa8] sm:$0xff]  ;;  %v1655_v25 = vld [vmem:[%s2034_s3 + $0xa0] sm:$0xff]  ;;  %v1654_v27 = vld [vmem:[%s2034_s3 + $0x98] sm:$0xff]  ;;  %s2012_s28 = scalar_lea.vmem %s2040_s9, %s1392_s25 }
  0x13   : > { %413 = vmatpush.bf16.msra.mxu0 %v1633_v4  ;;  %v1648_v24 = vld [vmem:[%s2034_s3 + $0x68] sm:$0xff]  ;;  %v1647_v26 = vld [vmem:[%s2034_s3 + $0x60] sm:$0xff]  ;;  %v1646_v28 = vld [vmem:[%s2034_s3 + $0x58] sm:$0xff] }
  0x14   : > { %716 = vmatpush.bf16.msra.mxu3 %v1657_v19  ;;  %v1653_v29 = vld [vmem:[%s2034_s3 + $0x90] sm:$0xff]  ;;  %v1686_v31 = vld [vmem:[%s2033_s2] ss:$0 sm:$0xff]  ;;  %v1652_v32 = vld [vmem:[%s2034_s3 + $0x88] sm:$0xff] }
  0x15   : > { %697 = vmatpush.bf16.msra.mxu2 %v1649_v21  ;;  %v1645_v30 = vld [vmem:[%s2034_s3 + $0x50] sm:$0xff]  ;;  %v1644_v34 = vld [vmem:[%s2034_s3 + $0x48] sm:$0xff]  ;;  %v1651_v36 = vld [vmem:[%s2034_s3 + $0x80] sm:$0xff] }
  0x16   : > { %679 = vmatpush.bf16.msra.mxu1 %v1640_v10  ;;  %v1643_v37 = vld [vmem:[%s2034_s3 + $0x40] sm:$0xff] }
  0x17   : > { %414 = vmatpush.bf16.msra.mxu0 %v1632_v5 }
  0x18   : > { %717 = vmatpush.bf16.msra.mxu3 %v1656_v22 }
  0x19   : > { %698 = vmatpush.bf16.msra.mxu2 %v1648_v24 }
  0x1a   : > { %680 = vmatpush.bf16.msra.mxu1 %v1639_v14 }
  0x1b   : > { %415 = vmatpush.bf16.msra.mxu0 %v1631_v7 }
  0x1c   : > { %718 = vmatpush.bf16.msra.mxu3 %v1655_v25 }
  0x1d   : > { %699 = vmatpush.bf16.msra.mxu2 %v1647_v26 }
  0x1e   : > { %681 = vmatpush.bf16.msra.mxu1 %v1638_v15 }
  0x1f   : > { %416 = vmatpush.bf16.msra.mxu0 %v1630_v9 }
  0x20   : > { %719 = vmatpush.bf16.msra.mxu3 %v1654_v27 }
  0x21   : > { %700 = vmatpush.bf16.msra.mxu2 %v1646_v28 }
  0x22   : > { %682 = vmatpush.bf16.msra.mxu1 %v1637_v17 }
  0x23   : > { %417 = vmatpush.bf16.msra.mxu0 %v1629_v11  ;;  %v1862_v11 = vld [vmem:[%s2035_s4] ss:$0 sm:$0xff] }
  0x24   : > { %720 = vmatpush.bf16.msra.mxu3 %v1653_v29 }
  0x25   : > { %701 = vmatpush.bf16.msra.mxu2 %v1645_v30 }
  0x26   : > { %1425 = vmatmul.msk.bf16.vlgmr.msra.gmra.mxu0 %vm399_vm1, %v1627_v12  ;;  %683 = vmatpush.bf16.msra.mxu1 %v1636_v20 }
  0x28   : > { %721 = vmatpush.bf16.msra.mxu3 %v1652_v32 }
  0x29   : > { %702 = vmatpush.bf16.msra.mxu2 %v1644_v34 }
  0x2a   : > { %684 = vmatpush.bf16.msra.mxu1 %v1635_v23 }
  0x2c   : > { %722 = vmatpush.bf16.msra.mxu3 %v1651_v36 }
  0x2d   : > { %703 = vmatpush.bf16.msra.mxu2 %v1643_v37 }
  0x36   : > { %1426 = vmatmul.msk.bf16.gmra.mxu0 %vm399_vm1, %v1628_v13  ;;  %vm957_vm1 = vcmask 1045509  }
  0xa3   : > { %v419_v33 = vpop.f32.mrf.mxu0 }
  0xa4   : > { %v420_v35 = vadd.f32 %v1686_v31, %v419_v33 }
  0xa6   : > { %v433_v38 = vmul.f32 0.01, %v420_v35  ;;  %vm429_vm2 = vcmp.gt.f32.partialorder %v420_v35, 0.0 }
  0xa8   : > { %v437_v40 = vsel %vm429_vm2, %v420_v35, %v433_v38  ;;  %vm959_vm2 = vcmask 1046534  }
  0xa9   : > { %v441_v43 = vpack.c.bf16 %v437_v40, %v437_v40 }
  0xab   : > { %v421_v39 = vpop.f32.mrf.mxu0  ;;  %v449_v46 = vunpack.c.l.b16 %v441_v43 }
  0xac   : > { %v422_v41 = vadd.f32 %v1686_v31, %v421_v39 }
  0xae   : > { %vm430_vm3 = vcmp.gt.f32.partialorder %v422_v41, 0.0  ;;  %v434_v42 = vmul.f32 0.01, %v422_v41 }
  0xb0   : > { %v438_v44 = vsel %vm430_vm3, %v422_v41, %v434_v42  ;;  %vm961_vm3 = vcmask 1047559  }
  0xb1   : > { %v442_v45 = vpack.c.bf16 %v438_v44, %v438_v44 }
  0xb3   : > { %v450_v47 = vunpack.c.l.b16 %v442_v45  ;;  %v424_v48 = vpop.f32.mrf.mxu0 }
  0xb4   : > { %v425_v49 = vadd.f32 %v1686_v31, %v424_v48 }
  0xb5   : > { %v453_v50 = vpack.c.b16 %v450_v47, %v449_v46 }
  0xb6   : > { %v435_v51 = vmul.f32 0.01, %v425_v49  ;;  %vm431_vm4 = vcmp.gt.f32.partialorder %v425_v49, 0.0 }
  0xb7   : > { %685 = vmatmul.bf16.vlgmr.msra.gmra.mxu1 %v453_v50  ;;  %v461_v59 = vshll.u32 %v453_v50, 16  ;;  %v476_v0 = vrot.slane %v453_v50, 1  ;;  %v459_v2 = vshrl.u32 %v453_v50, 16 }
  0xb8   : > { %v439_v53 = vsel %vm431_vm4, %v425_v49, %v435_v51  ;;  %v1662_v49 = vld [vmem:[%s2036_s5 + $0x18] sm:$0xff]  ;;  %vm992_vm4 = vcmask 523264  }
  0xb9   : > { %v443_v56 = vpack.c.bf16 %v439_v53, %v439_v53  ;;  %v463_v63 = vrot.slane %v461_v59, 1  ;;  %1056 = vmatpush.bf16.msrb.mxu1 %v1662_v49 }
  0xbb   : > { %v426_v52 = vpop.f32.mrf.mxu0  ;;  %v451_v60 = vunpack.c.l.b16 %v443_v56  ;;  %v464_v5 = vor.u32 %v463_v63, %v459_v2  ;;  %v1670_v63 = vld [vmem:[%s2036_s5 + $0x58] sm:$0xff] }
  0xbc   : > { %v427_v54 = vadd.f32 %v1686_v31, %v426_v52  ;;  %1121 = vmatpush.bf16.msrb.mxu2 %v1670_v63 }
  0xbe   : > { %vm432_vm5 = vcmp.gt.f32.partialorder %v427_v54, 0.0  ;;  %v436_v55 = vmul.f32 0.01, %v427_v54 }
  0xc0   : > { %v440_v57 = vsel %vm432_vm5, %v427_v54, %v436_v55 }
  0xc1   : > { %v444_v58 = vpack.c.bf16 %v440_v57, %v440_v57 }
  0xc3   : > { %v452_v61 = vunpack.c.l.b16 %v444_v58  ;;  %v1666_v58 = vld [vmem:[%s2036_s5 + $0x38] sm:$0xff] }
  0xc4   : > { %1000 = vmatpush.bf16.msrb.mxu0 %v1666_v58 }
  0xc5   : > { %v454_v62 = vpack.c.b16 %v452_v61, %v451_v60 }
  0xc7   : > { %690 = vmatmul.bf16.gmra.mxu1 %v454_v62  ;;  %v477_v1 = vrot.slane %v454_v62, 1  ;;  %v466_v3 = vshll.u32 %v454_v62, 16  ;;  %v470_v8 = vshrl.u32 %v454_v62, 16 }
  0xc9   : > { %v478_v4 = vsel %vm475_vm6, %v476_v0, %v477_v1  ;;  %v468_v6 = vrot.slane %v466_v3, 1 }
  0xca   : > { %723 = vmatmul.bf16.vlgmr.msra.gmra.mxu3 %v478_v4 }
  0xcb   : > { %v469_v7 = vsel %vm457_vm7, %v464_v5, %v468_v6  ;;  %v472_v9 = vor.u32 %v470_v8, %v468_v6  ;;  %v1661_v5 = vld [vmem:[%s2036_s5 + $0x10] sm:$0xff]  ;;  %vm1180_vm7 = vcmask 261120  }
  0xcc   : > { %704 = vmatmul.bf16.vlgmr.msra.gmra.mxu2 %v469_v7  ;;  %1057 = vmatpush.bf16.msrb.mxu1 %v1661_v5 }
  0xda   : > { %728 = vmatmul.bf16.gmra.mxu3 %v477_v1 }
  0xdc   : > { %709 = vmatmul.bf16.gmra.mxu2 %v472_v9 }
 0x134   : > { %v686_v10 = vpop.f32.mrf.mxu1 }
 0x135   : > { %v687_v12 = vadd.f32 %v1862_v11, %v686_v10  ;;  %v1669_v10 = vld [vmem:[%s2036_s5 + $0x50] sm:$0xff] }
 0x136   : > { %1122 = vmatpush.bf16.msrb.mxu2 %v1669_v10 }
 0x13c   : > { %v688_v17 = vpop.f32.mrf.mxu1 }
 0x13d   : > { %v689_v19 = vadd.f32 %v1862_v11, %v688_v17  ;;  %v1660_v17 = vld [vmem:[%s2036_s5 + $0x8] sm:$0xff] }
 0x13e   : > { %1058 = vmatpush.bf16.msrb.mxu1 %v1660_v17 }
 0x144   : > { %v691_v41 = vpop.f32.mrf.mxu1 }
 0x14d   : > { %v724_v13 = vpop.f32.mrf.mxu3 }
 0x14f   : > { %v705_v14 = vpop.f32.mrf.mxu2 }
 0x150   : > { %v706_v15 = vadd.f32 %v705_v14, %v687_v12  ;;  %v1665_v12 = vld [vmem:[%s2036_s5 + $0x30] sm:$0xff] }
 0x151   : > { %1001 = vmatpush.bf16.msrb.mxu0 %v1665_v12 }
 0x152   : > { %v725_v16 = vadd.f32 %v724_v13, %v706_v15 }
 0x154   : > { %vm734_vm8 = vcmp.gt.f32.partialorder %v725_v16, 0.0  ;;  %v738_v18 = vmul.f32 0.01, %v725_v16 }
 0x155   : > { %v726_v31 = vpop.f32.mrf.mxu3 }
 0x156   : > { %v742_v20 = vsel %vm734_vm8, %v725_v16, %v738_v18  ;;  %vm1318_vm8 = vcmask 130048  }
 0x157   : > { %v750_v21 = vrot.slane %v742_v20, 2  ;;  %v751_v22 = vrot.slane %v742_v20, 4  ;;  %v752_v23 = vrot.slane %v742_v20, 6  ;;  %v773_v24 = vsel %vm772_vm9, %v742_v20, -inf  ;;  %v707_v25 = vpop.f32.mrf.mxu2 }
 0x158   : > { %v774_v26 = vrot.slane %v773_v24, 4  ;;  %v708_v27 = vadd.f32 %v707_v25, %v689_v19 }
 0x159   : > { %v780_v28 = vsel %vm772_vm9, %v750_v21, -inf  ;;  %v787_v29 = vsel %vm772_vm9, %v751_v22, -inf  ;;  %v794_v30 = vsel %vm772_vm9, %v752_v23, -inf  ;;  %v693_v21 = vpop.f32.mrf.mxu1 }
 0x15a   : > { %v775_v32 = vmax.f32 %v773_v24, %v774_v26  ;;  %v781_v33 = vrot.slane %v780_v28, 4  ;;  %v788_v34 = vrot.slane %v787_v29, 4  ;;  %v795_v35 = vrot.slane %v794_v30, 4  ;;  %v1664_v26 = vld [vmem:[%s2036_s5 + $0x28] sm:$0xff] }
 0x15b   : > { %v727_v36 = vadd.f32 %v726_v31, %v708_v27  ;;  %v692_v27 = vadd.f32 %v1862_v11, %v691_v41  ;;  %1002 = vmatpush.bf16.msrb.mxu0 %v1664_v26 }
 0x15c   : > { %v776_v37 = vrot.slane %v775_v32, 2  ;;  %v782_v38 = vmax.f32 %v780_v28, %v781_v33  ;;  %v789_v39 = vmax.f32 %v787_v29, %v788_v34  ;;  %v796_v40 = vmax.f32 %v794_v30, %v795_v35  ;;  %v1668_v30 = vld [vmem:[%s2036_s5 + $0x48] sm:$0xff] }
 0x15d   : > { %vm735_vm10 = vcmp.gt.f32.partialorder %v727_v36, 0.0  ;;  %v739_v42 = vmul.f32 0.01, %v727_v36  ;;  %v729_v4 = vpop.f32.mrf.mxu3  ;;  %1123 = vmatpush.bf16.msrb.mxu2 %v1668_v30 }
 0x15e   : > { %v777_v43 = vmax.f32 %v775_v32, %v776_v37  ;;  %v783_v44 = vrot.slane %v782_v38, 2  ;;  %v790_v45 = vrot.slane %v789_v39, 2  ;;  %v797_v46 = vrot.slane %v796_v40, 2 }
 0x15f   : > { %v743_v47 = vsel %vm735_vm10, %v727_v36, %v739_v42  ;;  %v710_v48 = vpop.f32.mrf.mxu2  ;;  %v1659_v36 = vld [vmem:[%s2036_s5] sm:$0xff]  ;;  %v694_v37 = vadd.f32 %v1862_v11, %v693_v21  ;;  %vm1282_vm10 = vcmask 123904  }
 0x160   : > { %v778_v50 = vrot.slane %v777_v43, 1  ;;  %v784_v51 = vmax.f32 %v782_v38, %v783_v44  ;;  %v791_v52 = vmax.f32 %v789_v39, %v790_v45  ;;  %v798_v53 = vmax.f32 %v796_v40, %v797_v46  ;;  %v1663_v45 = vld [vmem:[%s2036_s5 + $0x20] sm:$0xff]  ;;  %1059 = vmatpush.bf16.msrb.mxu1 %v1659_v36 }
 0x161   : > { %v753_v54 = vrot.slane %v743_v47, 2  ;;  %v754_v55 = vrot.slane %v743_v47, 4  ;;  %v755_v56 = vrot.slane %v743_v47, 6  ;;  %v801_v57 = vsel %vm772_vm9, %v743_v47, -inf  ;;  %v1667_v11 = vld [vmem:[%s2036_s5 + $0x40] sm:$0xff]  ;;  %1003 = vmatpush.bf16.msrb.mxu0 %v1663_v45 }
 0x162   : > { %v779_v59 = vmax.f32 %v777_v43, %v778_v50  ;;  %v785_v60 = vrot.slane %v784_v51, 1  ;;  %v792_v61 = vrot.slane %v791_v52, 1  ;;  %v799_v62 = vrot.slane %v798_v53, 1  ;;  %1124 = vmatpush.bf16.msrb.mxu2 %v1667_v11 }
 0x163   : > { %v802_v0 = vrot.slane %v801_v57, 4  ;;  %v808_v1 = vsel %vm772_vm9, %v753_v54, -inf  ;;  %v815_v2 = vsel %vm772_vm9, %v754_v55, -inf  ;;  %v822_v3 = vsel %vm772_vm9, %v755_v56, -inf }
 0x164   : > { %v786_v6 = vmax.f32 %v784_v51, %v785_v60  ;;  %v793_v7 = vmax.f32 %v791_v52, %v792_v61  ;;  %v800_v8 = vmax.f32 %v798_v53, %v799_v62  ;;  %v878_v9 = vpack.c.bf16 %v779_v59, %v779_v59 }
 0x165   : > { %v803_v13 = vmax.f32 %v801_v57, %v802_v0  ;;  %v809_v14 = vrot.slane %v808_v1, 4  ;;  %v816_v15 = vrot.slane %v815_v2, 4  ;;  %v823_v16 = vrot.slane %v822_v3, 4  ;;  %v731_v53 = vpop.f32.mrf.mxu3 }
 0x166   : > { %v879_v18 = vpack.c.bf16 %v786_v6, %v786_v6  ;;  %v880_v19 = vpack.c.bf16 %v793_v7, %v793_v7  ;;  %v881_v20 = vpack.c.bf16 %v800_v8, %v800_v8  ;;  %v1901_v29 = vperm.slane %v878_v9, 0 }
 0x167   : > { %v804_v22 = vrot.slane %v803_v13, 2  ;;  %v810_v23 = vmax.f32 %v808_v1, %v809_v14  ;;  %v817_v24 = vmax.f32 %v815_v2, %v816_v15  ;;  %v824_v25 = vmax.f32 %v822_v3, %v823_v16  ;;  %v712_v35 = vpop.f32.mrf.mxu2 }
 0x168   : > { %v1899_v28 = vperm.slane %v879_v18, 0  ;;  %v924_v38 = vperm.slane %v880_v19, 0  ;;  %v925_v39 = vperm.slane %v881_v20, 0  ;;  %v711_v40 = vadd.f32 %v710_v48, %v692_v27 }
 0x169   : > { %v805_v31 = vmax.f32 %v803_v13, %v804_v22  ;;  %v811_v32 = vrot.slane %v810_v23, 2  ;;  %v818_v33 = vrot.slane %v817_v24, 2  ;;  %v825_v34 = vrot.slane %v824_v25, 2 }
 0x16a   : > { %v936_v46 = vunpack.c.l.b16 %v1899_v28  ;;  %v1012_v47 = vunpack.c.l.b16 %v1901_v29  ;;  %v730_v49 = vadd.f32 %v729_v4, %v711_v40  ;;  %v713_v50 = vadd.f32 %v712_v35, %v694_v37 }
 0x16b   : > { %v806_v41 = vrot.slane %v805_v31, 1  ;;  %v812_v42 = vmax.f32 %v810_v23, %v811_v32  ;;  %v819_v43 = vmax.f32 %v817_v24, %v818_v33  ;;  %v826_v44 = vmax.f32 %v824_v25, %v825_v34 }
 0x16c   : > { %v1918_v55 = vunpack.c.l.b16 %v924_v38  ;;  %vm736_vm11 = vcmp.gt.f32.partialorder %v730_v49, 0.0  ;;  %v740_v56 = vmul.f32 0.01, %v730_v49  ;;  %v732_v57 = vadd.f32 %v731_v53, %v713_v50 }
 0x16d   : > { %v807_v48 = vmax.f32 %v805_v31, %v806_v41  ;;  %v813_v51 = vrot.slane %v812_v42, 1  ;;  %v820_v52 = vrot.slane %v819_v43, 1  ;;  %v827_v54 = vrot.slane %v826_v44, 1 }
 0x16e   : > { %v1920_v58 = vunpack.c.l.b16 %v925_v39  ;;  %v744_v62 = vsel %vm736_vm11, %v730_v49, %v740_v56  ;;  %vm737_vm12 = vcmp.gt.f32.partialorder %v732_v57, 0.0  ;;  %v741_v63 = vmul.f32 0.01, %v732_v57 }
 0x16f   : > { %v814_v59 = vmax.f32 %v812_v42, %v813_v51  ;;  %v882_v60 = vpack.c.bf16 %v807_v48, %v807_v48  ;;  %v821_v61 = vmax.f32 %v819_v43, %v820_v52  ;;  %v1922_v0 = vmax.f32 %v826_v44, %v827_v54 }
 0x170   : > { %v756_v2 = vrot.slane %v744_v62, 2  ;;  %v757_v3 = vrot.slane %v744_v62, 4  ;;  %v758_v4 = vrot.slane %v744_v62, 6  ;;  %v829_v5 = vsel %vm772_vm9, %v744_v62, -inf }
 0x171   : > { %v926_v1 = vperm.slane %v882_v60, 0  ;;  %v745_v6 = vsel %vm737_vm12, %v732_v57, %v741_v63  ;;  %v883_v7 = vpack.c.bf16 %v814_v59, %v814_v59  ;;  %v884_v8 = vpack.c.bf16 %v821_v61, %v821_v61 }
 0x172   : > { %v830_v10 = vrot.slane %v829_v5, 4  ;;  %v836_v12 = vsel %vm772_vm9, %v756_v2, -inf  ;;  %v843_v13 = vsel %vm772_vm9, %v757_v3, -inf  ;;  %v850_v16 = vsel %vm772_vm9, %v758_v4, -inf }
 0x173   : > { %v1925_v9 = vunpack.c.l.b16 %v926_v1  ;;  %v837_v14 = vrot.slane %v836_v12, 4  ;;  %v844_v15 = vrot.slane %v843_v13, 4  ;;  %v759_v17 = vrot.slane %v745_v6, 2 }
 0x174   : > { %v831_v18 = vmax.f32 %v829_v5, %v830_v10  ;;  %v851_v19 = vrot.slane %v850_v16, 4  ;;  %v760_v20 = vrot.slane %v745_v6, 4  ;;  %v857_v21 = vsel %vm772_vm9, %v745_v6, -inf }
 0x175   : > { %v838_v22 = vmax.f32 %v836_v12, %v837_v14  ;;  %v845_v23 = vmax.f32 %v843_v13, %v844_v15  ;;  %v858_v24 = vrot.slane %v857_v21, 4  ;;  %v864_v25 = vsel %vm772_vm9, %v759_v17, -inf }
 0x176   : > { %v832_v26 = vrot.slane %v831_v18, 2  ;;  %v852_v27 = vmax.f32 %v850_v16, %v851_v19  ;;  %v865_v30 = vrot.slane %v864_v25, 4  ;;  %v871_v31 = vsel %vm772_vm9, %v760_v20, -inf }
 0x177   : > { %v839_v32 = vrot.slane %v838_v22, 2  ;;  %v846_v33 = vrot.slane %v845_v23, 2  ;;  %v859_v34 = vmax.f32 %v857_v21, %v858_v24  ;;  %v872_v35 = vrot.slane %v871_v31, 4 }
 0x178   : > { %v833_v36 = vmax.f32 %v831_v18, %v832_v26  ;;  %v853_v37 = vrot.slane %v852_v27, 2  ;;  %v866_v38 = vmax.f32 %v864_v25, %v865_v30  ;;  %v885_v39 = vpack.c.bf16 %v1922_v0, %v1922_v0 }
 0x179   : > { %v840_v40 = vmax.f32 %v838_v22, %v839_v32  ;;  %v847_v41 = vmax.f32 %v845_v23, %v846_v33  ;;  %v860_v42 = vrot.slane %v859_v34, 2  ;;  %v873_v43 = vmax.f32 %v871_v31, %v872_v35 }
 0x17a   : > { %v834_v44 = vrot.slane %v833_v36, 1  ;;  %v854_v45 = vmax.f32 %v852_v27, %v853_v37  ;;  %v867_v49 = vrot.slane %v866_v38, 2  ;;  %v927_v50 = vperm.slane %v883_v7, 0 }
 0x17b   : > { %v841_v11 = vrot.slane %v840_v40, 1  ;;  %v848_v48 = vrot.slane %v847_v41, 1  ;;  %v861_v51 = vmax.f32 %v859_v34, %v860_v42  ;;  %v874_v52 = vrot.slane %v873_v43, 2 }
 0x17c   : > { %v835_v53 = vmax.f32 %v833_v36, %v834_v44  ;;  %v855_v54 = vrot.slane %v854_v45, 1  ;;  %v868_v56 = vmax.f32 %v866_v38, %v867_v49  ;;  %v928_v57 = vperm.slane %v884_v8, 0 }
 0x17d   : > { %v842_v59 = vmax.f32 %v840_v40, %v841_v11  ;;  %v849_v60 = vmax.f32 %v847_v41, %v848_v48  ;;  %v862_v61 = vrot.slane %v861_v51, 1  ;;  %v875_v62 = vmax.f32 %v873_v43, %v874_v52 }
 0x17e   : > { %v886_v63 = vpack.c.bf16 %v835_v53, %v835_v53  ;;  %v869_v0 = vrot.slane %v868_v56, 1  ;;  %v856_v1 = vmax.f32 %v854_v45, %v855_v54  ;;  %v929_v2 = vperm.slane %v885_v39, 0 }
 0x17f   : > { %v887_v3 = vpack.c.bf16 %v842_v59, %v842_v59  ;;  %v863_v4 = vmax.f32 %v861_v51, %v862_v61  ;;  %v876_v5 = vrot.slane %v875_v62, 1  ;;  %v888_v6 = vpack.c.bf16 %v849_v60, %v849_v60 }
 0x180   : > { %v930_v7 = vperm.slane %v886_v63, 0  ;;  %v889_v10 = vpack.c.bf16 %v856_v1, %v856_v1  ;;  %v940_v12 = vunpack.c.l.b16 %v927_v50  ;;  %v941_v13 = vunpack.c.l.b16 %v928_v57 }
 0x181   : > { %v931_v14 = vperm.slane %v887_v3, 0  ;;  %v890_v8 = vpack.c.bf16 %v863_v4, %v863_v4  ;;  %v932_v15 = vperm.slane %v888_v6, 0  ;;  %v942_v16 = vunpack.c.l.b16 %v929_v2  ;;  %v1674_v2 = vld [vmem:[%s2038_s7 + $0x18] sm:$0xff]  ;;  %v1673_v3 = vld [vmem:[%s2038_s7 + $0x10] sm:$0xff]  ;;  %v1672_v4 = vld [vmem:[%s2038_s7 + $0x8] sm:$0xff] }
 0x182   : > { %v943_v17 = vunpack.c.l.b16 %v930_v7  ;;  %v933_v18 = vperm.slane %v889_v10, 0  ;;  %v1013_v19 = vsel %vm949_vm13, %v936_v46, %v1012_v47  ;;  %v870_v26 = vmax.f32 %v868_v56, %v869_v0  ;;  %1190 = vmatpush.bf16.msrb.mxu3 %v1674_v2  ;;  %1218 = vmatpush.bf16.msra.mxu0 %v1672_v4  ;;  %v1671_v6 = vld [vmem:[%s2038_s7] sm:$0xff] }
 0x183   : > { %v944_v20 = vunpack.c.l.b16 %v931_v14  ;;  %v934_v21 = vperm.slane %v890_v8, 0  ;;  %v945_v22 = vunpack.c.l.b16 %v932_v15  ;;  %v1014_v23 = vsel %vm951_vm14, %v1918_v55, %v1013_v19  ;;  %v1675_v7 = vld [vmem:[%s2038_s7 + $0x20] sm:$0xff] }
 0x184   : > { %v946_v24 = vunpack.c.l.b16 %v933_v18  ;;  %v1015_v25 = vsel %vm953_vm15, %v1920_v58, %v1014_v23  ;;  %v950_v29 = vsel %vm949_vm13, %v1918_v55, %v936_v46  ;;  %v891_v34 = vpack.c.bf16 %v870_v26, %v870_v26  ;;  %v1688_v14 = vld [vmem:[%s2037_s6] ss:$0 sm:$0xff] }
 0x185   : > { %v947_v27 = vunpack.c.l.b16 %v934_v21  ;;  %v1016_v47 = vsel %vm955_vm0, %v1925_v9, %v1015_v25  ;;  %v1020_v30 = vsel %vm949_vm13, %v944_v20, %v943_v17  ;;  %v952_v31 = vsel %vm951_vm14, %v1920_v58, %v950_v29 }
 0x186   : > { %v1017_v32 = vsel %vm957_vm1, %v940_v12, %v1016_v47  ;;  %v1021_v33 = vsel %vm951_vm14, %v945_v22, %v1020_v30  ;;  %v954_v28 = vsel %vm953_vm15, %v1925_v9, %v952_v31  ;;  %v963_v37 = vsel %vm949_vm13, %v945_v22, %v944_v20  ;;  %1191 = vmatpush.bf16.msrb.mxu3 %v1673_v3 }
 0x187   : > { %v1018_v35 = vsel %vm959_vm2, %v941_v13, %v1017_v32  ;;  %v1022_v46 = vsel %vm953_vm15, %v946_v24, %v1021_v33  ;;  %v956_v36 = vsel %vm955_vm0, %v940_v12, %v954_v28  ;;  %v935_v40 = vperm.slane %v891_v34, 0  ;;  %1219 = vmatpush.bf16.msra.mxu0 %v1671_v6 }
 0x188   : > { %v1019_v38 = vsel %vm961_vm3, %v942_v16, %v1018_v35  ;;  %v1023_v39 = vsel %vm955_vm0, %v947_v27, %v1022_v46  ;;  %v958_v41 = vsel %vm957_vm1, %v941_v13, %v956_v36  ;;  %v964_v43 = vsel %vm951_vm14, %v946_v24, %v963_v37 }
 0x189   : > { %v1024_v42 = vpack.c.b16 %v1023_v39, %v1019_v38  ;;  %v877_v44 = vmax.f32 %v875_v62, %v876_v5  ;;  %v948_v45 = vunpack.c.l.b16 %v935_v40  ;;  %v965_v49 = vsel %vm953_vm15, %v947_v27, %v964_v43  ;;  %v1676_v5 = vld [vmem:[%s2038_s7 + $0x28] sm:$0xff]  ;;  %v1689_v39 = vld [vmem:[%s2039_s8] ss:$0 sm:$0xff] }
 0x18a   : > { %v1078_v50 = vsel %vm949_vm13, %v1920_v58, %v1918_v55  ;;  %v960_v11 = vsel %vm959_vm2, %v942_v16, %v958_v41  ;;  %v1085_v52 = vsel %vm949_vm13, %v946_v24, %v945_v22  ;;  %1253 = vmatpush.bf16.msra.mxu1 %v1676_v5  ;;  %v1698_v40 = vmov 0.0  }
 0x18b   : > { %1564 = vmatmul.msk.bf16.vlgmr.msrb.gmra.mxu1 %vm992_vm4, %v1024_v42  ;;  %v892_v48 = vpack.c.bf16 %v877_v44, %v877_v44  ;;  %v1079_v51 = vsel %vm951_vm14, %v1925_v9, %v1078_v50  ;;  %v962_v53 = vsel %vm961_vm3, %v943_v17, %v960_v11  ;;  %v966_v54 = vsel %vm955_vm0, %v948_v45, %v965_v49 }
 0x18c   : > { %v1080_v56 = vsel %vm953_vm15, %v940_v12, %v1079_v51  ;;  %v1086_v57 = vsel %vm951_vm14, %v947_v27, %v1085_v52  ;;  %v967_v59 = vpack.c.b16 %v966_v54, %v962_v53  ;;  %1319 = vst.msk [vmem:[%s2012_s28] sm:$0xff] %vm1318_vm8, %v1698_v40  ;;  %vm1330_vm12 = vcmask 126976  }
 0x18d   : > { %v1076_v55 = vperm.slane %v892_v48, 0  ;;  %v1081_v58 = vsel %vm955_vm0, %v941_v13, %v1080_v56  ;;  %v1087_v61 = vsel %vm953_vm15, %v948_v45, %v1086_v57 }
 0x18e   : > { %v1082_v60 = vsel %vm957_vm1, %v942_v16, %v1081_v58  ;;  %1547 = vmatmul.msk.bf16.vlgmr.msrb.gmra.mxu0 %vm992_vm4, %v967_v59  ;;  %1254 = vmatpush.bf16.msra.mxu1 %v1675_v7 }
 0x18f   : > { %v1077_v9 = vunpack.c.l.b16 %v1076_v55  ;;  %v1083_v62 = vsel %vm959_vm2, %v943_v17, %v1082_v60 }
 0x190   : > { %v1084_v63 = vsel %vm961_vm3, %v944_v20, %v1083_v62 }
 0x191   : > { %v1088_v0 = vsel %vm955_vm0, %v1077_v9, %v1087_v61 }
 0x192   : > { %v1089_v1 = vpack.c.b16 %v1088_v0, %v1084_v63 }
 0x194   : > { %1589 = vmatmul.msk.bf16.vlgmr.msrb.gmra.mxu2 %vm992_vm4, %v1089_v1 }
 0x208   : > { %v1061_v12 = vpop.f32.mrf.mxu1 }
 0x20b   : > { %v1005_v10 = vpop.f32.mrf.mxu0 }
 0x20c   : > { %v1062_v13 = vadd.f32 %v1061_v12, %v1005_v10 }
 0x210   : > { %v1063_v18 = vpop.f32.mrf.mxu1 }
 0x213   : > { %v1007_v17 = vpop.f32.mrf.mxu0 }
 0x214   : > { %v1064_v20 = vadd.f32 %v1063_v18, %v1007_v17 }
 0x217   : > { %v1126_v8 = vpop.f32.mrf.mxu2 }
 0x218   : > { %v1131_v15 = vadd.f32 %v1126_v8, %v1062_v13 }
 0x21a   : > { %v1137_v16 = vadd.f32 %v1688_v14, %v1131_v15 }
 0x21c   : > { %v1141_v19 = vmul.f32 0.01, %v1137_v16  ;;  %vm1139_vm5 = vcmp.gt.f32.partialorder %v1137_v16, 0.0 }
 0x21e   : > { %v1143_v23 = vsel %vm1139_vm5, %v1137_v16, %v1141_v19 }
 0x21f   : > { %v1128_v21 = vpop.f32.mrf.mxu2  ;;  %v1145_v26 = vpack.c.bf16 %v1143_v23, %v1143_v23 }
 0x220   : > { %v1132_v22 = vadd.f32 %v1128_v21, %v1064_v20 }
 0x221   : > { %v1158_v47 = vunpack.c.l.b16 %v1145_v26 }
 0x222   : > { %v1138_v24 = vadd.f32 %v1688_v14, %v1132_v22 }
 0x224   : > { %vm1140_vm6 = vcmp.gt.f32.partialorder %v1138_v24, 0.0  ;;  %v1142_v25 = vmul.f32 0.01, %v1138_v24 }
 0x226   : > { %v1144_v29 = vsel %vm1140_vm6, %v1138_v24, %v1142_v25 }
 0x227   : > { %v1146_v27 = vpack.c.bf16 %v1144_v29, %v1144_v29 }
 0x229   : > { %v1159_v30 = vunpack.c.l.b16 %v1146_v27 }
 0x22b   : > { %v1160_v31 = vpack.c.b16 %v1159_v30, %v1158_v47 }
 0x22d   : > { %1611 = vmatmul.msk.bf16.vlgmr.msra.gmra.mxu0 %vm1180_vm7, %v1160_v31  ;;  %v1231_v32 = vrot.slane %v1160_v31, 1  ;;  %v1164_v33 = vshll.u32 %v1160_v31, 16  ;;  %v1162_v34 = vshrl.u32 %v1160_v31, 16 }
 0x22f   : > { %1624 = vmatmul.msk.bf16.vlgmr.msra.gmra.mxu1 %vm1180_vm7, %v1231_v32  ;;  %v1166_v28 = vrot.slane %v1164_v33, 1 }
 0x231   : > { %v1167_v35 = vor.u32 %v1166_v28, %v1162_v34 }
 0x233   : > { %1602 = vmatmul.msk.bf16.vlgmr.msrb.gmra.mxu3 %vm1180_vm7, %v1167_v35 }
 0x2aa   : > { %v1221_v46 = vpop.f32.mrf.mxu0 }
 0x2ac   : > { %v1256_v36 = vpop.f32.mrf.mxu1 }
 0x2b2   : > { %v1223_v44 = vpop.f32.mrf.mxu0 }
 0x2b4   : > { %v1258_v11 = vpop.f32.mrf.mxu1 }
 0x2b6   : > { %v1193_v37 = vpop.f32.mrf.mxu3 }
 0x2b7   : > { %v1222_v38 = vadd.f32 %v1221_v46, %v1193_v37 }
 0x2b9   : > { %v1261_v41 = vadd.f32 %v1256_v36, %v1222_v38 }
 0x2bb   : > { %v1267_v42 = vadd.f32 %v1689_v39, %v1261_v41 }
 0x2bd   : > { %vm1269_vm9 = vcmp.gt.f32.partialorder %v1267_v42, 0.0  ;;  %v1271_v43 = vmul.f32 0.01, %v1267_v42 }
 0x2be   : > { %v1195_v45 = vpop.f32.mrf.mxu3 }
 0x2bf   : > { %v1273_v49 = vsel %vm1269_vm9, %v1267_v42, %v1271_v43  ;;  %v1224_v50 = vadd.f32 %v1223_v44, %v1195_v45 }
 0x2c0   : > { %v1276_v48 = vrot.slane %v1273_v49, 2  ;;  %v1277_v51 = vrot.slane %v1273_v49, 4  ;;  %v1278_v52 = vrot.slane %v1273_v49, 6  ;;  %v1283_v53 = vsel %vm1282_vm10, %v1273_v49, -inf }
 0x2c1   : > { %v1284_v54 = vrot.slane %v1283_v53, 4  ;;  %v1262_v56 = vadd.f32 %v1258_v11, %v1224_v50 }
 0x2c2   : > { %v1290_v57 = vsel %vm1282_vm10, %v1276_v48, -inf  ;;  %v1297_v59 = vsel %vm1282_vm10, %v1277_v51, -inf  ;;  %v1304_v55 = vsel %vm1282_vm10, %v1278_v52, -inf }
 0x2c3   : > { %v1285_v58 = vmax.f32 %v1283_v53, %v1284_v54  ;;  %v1291_v60 = vrot.slane %v1290_v57, 4  ;;  %v1298_v61 = vrot.slane %v1297_v59, 4  ;;  %v1305_v9 = vrot.slane %v1304_v55, 4 }
 0x2c4   : > { %v1268_v62 = vadd.f32 %v1689_v39, %v1262_v56 }
 0x2c5   : > { %v1286_v63 = vrot.slane %v1285_v58, 2  ;;  %v1292_v0 = vmax.f32 %v1290_v57, %v1291_v60  ;;  %v1299_v1 = vmax.f32 %v1297_v59, %v1298_v61  ;;  %v1306_v2 = vmax.f32 %v1304_v55, %v1305_v9 }
 0x2c6   : > { %vm1270_vm11 = vcmp.gt.f32.partialorder %v1268_v62, 0.0  ;;  %v1272_v3 = vmul.f32 0.01, %v1268_v62 }
 0x2c7   : > { %v1287_v4 = vmax.f32 %v1285_v58, %v1286_v63  ;;  %v1293_v5 = vrot.slane %v1292_v0, 2  ;;  %v1300_v6 = vrot.slane %v1299_v1, 2  ;;  %v1307_v13 = vrot.slane %v1306_v2, 2 }
 0x2c8   : > { %v1274_v7 = vsel %vm1270_vm11, %v1268_v62, %v1272_v3 }
 0x2c9   : > { %v1294_v10 = vmax.f32 %v1292_v0, %v1293_v5  ;;  %v1301_v12 = vmax.f32 %v1299_v1, %v1300_v6  ;;  %v1311_v14 = vsel %vm1282_vm10, %v1274_v7, -inf  ;;  %v1288_v8 = vrot.slane %v1287_v4, 1 }
 0x2ca   : > { %v1312_v17 = vrot.slane %v1311_v14, 4  ;;  %v1308_v19 = vmax.f32 %v1306_v2, %v1307_v13 }
 0x2cb   : > { %v1295_v15 = vrot.slane %v1294_v10, 1  ;;  %v1302_v16 = vrot.slane %v1301_v12, 1  ;;  %v1289_v21 = vmax.f32 %v1287_v4, %v1288_v8 }
 0x2cc   : > { %v1313_v20 = vmax.f32 %v1311_v14, %v1312_v17  ;;  %v1309_v24 = vrot.slane %v1308_v19, 1 }
 0x2cd   : > { %v1296_v18 = vmax.f32 %v1294_v10, %v1295_v15  ;;  %v1303_v22 = vmax.f32 %v1301_v12, %v1302_v16 }
 0x2ce   : > { %v1314_v23 = vrot.slane %v1313_v20, 2  ;;  %v1310_v47 = vmax.f32 %v1308_v19, %v1309_v24 }
 0x2cf   : > { %v1325_v25 = vsel %vm949_vm13, %v1296_v18, %v1289_v21 }
 0x2d0   : > { %v1315_v26 = vmax.f32 %v1313_v20, %v1314_v23  ;;  %v1326_v27 = vsel %vm951_vm14, %v1303_v22, %v1325_v25 }
 0x2d1   : > { %v1327_v31 = vsel %vm953_vm15, %v1310_v47, %v1326_v27 }
 0x2d2   : > { %v1316_v29 = vrot.slane %v1315_v26, 1 }
 0x2d4   : > { %v1317_v30 = vmax.f32 %v1315_v26, %v1316_v29 }
 0x2d6   : > { %v1328_v32 = vsel %vm955_vm0, %v1317_v30, %v1327_v31 }
 0x2d7   : > { %1331 = vst.msk [vmem:[%s2012_s28] sm:$0x1f] %vm1330_vm12, %v1328_v32 }
 0x2d8 PF: > { %s19_s30 = sadd.s32 1, %s1696_s30  }
 0x2d9   : > { %p16_p5 = scmp.ge.s32.totalorder %s19_s30, 4  }
 0x2db   :  { %18 = sbr.rel (!%p16_p5) target bundleno = 1 (0x1), region = 90 }

</bundles_post_ra>
